<compile_context>
chip_gen: v7x
topology: tpu7x:2x2x1
jax: 0.10.0
libtpu: 0.0.40
codegen_flags: <defaults>
</compile_context>

<pallas_src>
import jax
import jax.numpy as jnp
from jax import lax
from jax.experimental import pallas as pl
from jax.experimental.pallas import tpu as pltpu

SELU_ALPHA = 1.6732632423543772848170429916717
SELU_SCALE = 1.0507009873554804934193349852946


def _selu(x):
    return SELU_SCALE * jnp.where(x > 0, x, SELU_ALPHA * (jnp.exp(x) - 1.0))


# --------------------- Pass 1: per-(sample, channel) spatial sums ---------------------
def _make_pool_sum_kernel(ts, S, ragged):
    def kernel(x_ref, sum_ref):
        # x_ref:   (Nb, C, ts)  current spatial tile
        # sum_ref: (Nb, C, 1)   f32 accumulator, resident across the spatial grid axis
        @pl.when(pl.program_id(1) == 0)
        def _():
            sum_ref[...] = jnp.zeros_like(sum_ref)

        x = x_ref[...].astype(jnp.float32)
        if ragged:
            # Last spatial tile is partial: its out-of-bounds lanes hold
            # unspecified VMEM data, so zero them before reducing.  Cheap VPU
            # select; the kernel is HBM-bandwidth bound anyway.
            sid = pl.program_id(1)
            lane = lax.broadcasted_iota(jnp.int32, x.shape, dimension=2)
            x = jnp.where(sid * ts + lane < S, x, 0.0)

        # Cross-lane reduce runs on the XLU -- free relative to the DMA stream.
        sum_ref[...] += jnp.sum(x, axis=-1, keepdims=True)

    return kernel


# --------------------- Pass 2: broadcast channel-gate scale ---------------------
def _scale_kernel(x_ref, gate_ref, o_ref):
    # Multiply in the input's native dtype; only the tiny (Nb, C, 1) gate is cast.
    o_ref[...] = x_ref[...] * gate_ref[...].astype(o_ref.dtype)


# --------------------------------- tiling helpers ---------------------------------
def _largest_divisor_leq(n, cap):
    cap = max(1, min(n, cap))
    for d in range(cap, 0, -1):
        if n % d == 0:
            return d
    return 1


def _choose_tiling(N, C, S, itemsize, block_budget_bytes):
    """Pick (Nb, ts): lane-dense spatial tile (multiple of 128, or the full
    spatial extent when it fits) bounded by a per-block VMEM budget; batch
    samples (Nb) when a whole sample is small.  No host-side padding is ever
    required -- ragged tails are handled in-kernel / by clamped writeback."""
    max_ts = max(128, (block_budget_bytes // max(1, C * itemsize)) // 128 * 128)
    if S <= max_ts:
        ts = S                      # full spatial extent in one tile
        nb_cap = max(1, block_budget_bytes // max(1, C * ts * itemsize))
        nb = _largest_divisor_leq(N, nb_cap)
    else:
        ts = max_ts                 # multiple of 128; last tile may be partial
        nb = 1
    return nb, ts


# ----------------------------------- entry point -----------------------------------
def se_selu_block(x, w1, w2, *, block_budget_bytes=2 * 1024 * 1024):
    """x: (N, C, D, H, W); w1: (Cr, C); w2: (C, Cr).  Returns same shape/dtype as x."""
    N, C, D, H, W = x.shape
    S = D * H * W
    x_flat = x.reshape(N, C, S)

    itemsize = jnp.dtype(x.dtype).itemsize
    nb, ts = _choose_tiling(N, C, S, itemsize, block_budget_bytes)
    n_blocks = N // nb
    s_blocks = pl.cdiv(S, ts)
    ragged = (S % ts) != 0

    # ---- Pass 1: per-(sample, channel) spatial sums (f32) ----
    sums = pl.pallas_call(
        _make_pool_sum_kernel(ts, S, ragged),
        out_shape=jax.ShapeDtypeStruct((N, C, 1), jnp.float32),
        grid_spec=pltpu.PrefetchScalarGridSpec(
            num_scalar_prefetch=0,
            grid=(n_blocks, s_blocks),
            in_specs=[pl.BlockSpec((nb, C, ts), lambda n, s: (n, 0, s))],
            out_specs=pl.BlockSpec((nb, C, 1), lambda n, s: (n, 0, 0)),
        ),
        compiler_params=pltpu.CompilerParams(
            dimension_semantics=("parallel", "arbitrary")),
    )(x_flat)

    # ---- Tiny SE head (FC1 -> SELU -> FC2 -> sigmoid) as one batched matmul ----
    # Hoisted out of the kernels: (N,Cr)/(N,C) work is negligible and in-kernel
    # (C,1)-shaped dots would waste 127/128 MXU lanes.
    pooled = sums[..., 0] * (1.0 / S)                              # (N, C) true mean
    h = _selu(pooled @ w1.astype(jnp.float32).T)                   # (N, Cr)
    gate = jax.nn.sigmoid(h @ w2.astype(jnp.float32).T)            # (N, C)
    gate = gate.reshape(N, C, 1)

    # ---- Pass 2: stream x tiles and scale by the per-sample channel gate ----
    out_flat = pl.pallas_call(
        _scale_kernel,
        out_shape=jax.ShapeDtypeStruct((N, C, S), x.dtype),
        grid_spec=pltpu.PrefetchScalarGridSpec(
            num_scalar_prefetch=0,
            grid=(n_blocks, s_blocks),
            in_specs=[
                pl.BlockSpec((nb, C, ts), lambda n, s: (n, 0, s)),
                pl.BlockSpec((nb, C, 1), lambda n, s: (n, 0, 0)),   # gate: fetched once per n
            ],
            out_specs=pl.BlockSpec((nb, C, ts), lambda n, s: (n, 0, s)),
        ),
        compiler_params=pltpu.CompilerParams(
            dimension_semantics=("parallel", "parallel")),
    )(x_flat, gate)

    return out_flat.reshape(N, C, D, H, W)


# ------------------------------------ reference ------------------------------------
def _reference(x, w1, w2):
    xf = x.astype(jnp.float32)
    pooled = jnp.mean(xf, axis=(2, 3, 4))                          # (N, C)
    h = _selu(pooled @ w1.astype(jnp.float32).T)                   # (N, Cr)
    s = jax.nn.sigmoid(h @ w2.astype(jnp.float32).T)               # (N, C)
    return (xf * s[:, :, None, None, None]).astype(x.dtype)


if __name__ == "__main__":
    # Shapes consistent with the module: in_channels=32, reduction_ratio=16.
    C = 32
    reduction_ratio = 16
    Cr = C // reduction_ratio

    key = jax.random.PRNGKey(0)
    kx1, kx2, k1, k2 = jax.random.split(key, 4)

    # Conv3d 1x1x1 without bias -> plain (Cr, C) / (C, Cr) matrices.
    w1 = jax.random.normal(k1, (Cr, C), dtype=jnp.float32) * (1.0 / (C ** 0.5))
    w2 = jax.random.normal(k2, (C, Cr), dtype=jnp.float32) * (1.0 / (Cr ** 0.5))

    # Case 1: spatial extent fits in one lane-dense tile (batched samples per block).
    x1 = jax.random.normal(kx1, (2, C, 4, 8, 8), dtype=jnp.float32)
    y1 = se_selu_block(x1, w1, w2)
    jax.block_until_ready(y1)
    y1_ref = _reference(x1, w1, w2)
    assert y1.shape == y1_ref.shape and y1.dtype == y1_ref.dtype
    assert jnp.allclose(y1, y1_ref, atol=1e-5, rtol=1e-5), "case1 mismatch vs reference"

    # Case 2: ragged spatial tiling (forced small tile budget) exercising the
    # masked pass-1 reduce and clamped pass-2 writeback -- no host-side padding.
    x2 = jax.random.normal(kx2, (2, C, 5, 10, 13), dtype=jnp.float32)
    y2 = se_selu_block(x2, w1, w2, block_budget_bytes=64 * 1024)
    jax.block_until_ready(y2)
    y2_ref = _reference(x2, w1, w2)
    assert y2.shape == y2_ref.shape and y2.dtype == y2_ref.dtype
    assert jnp.allclose(y2, y2_ref, atol=1e-5, rtol=1e-5), "case2 mismatch vs reference"

    print("KERNEL_OK")
</pallas_src>

<mosaic_0001>
module attributes {stable_mosaic.version = 11 : i64} {
  func.func @kernel(%arg0: i32, %arg1: i32, %arg2: memref<2x32x256xf32, #tpu.memory_space<vmem>>, %arg3: memref<2x32x1xf32, #tpu.memory_space<vmem>>) attributes {dimension_semantics = [#tpu.dimension_semantics<parallel>, #tpu.dimension_semantics<arbitrary>], iteration_bounds = array<i64: 1, 1>, scalar_prefetch = 0 : i64, scratch_operands = 0 : i64, tpu.core_type = #tpu.core_type<tc>, window_params = [{transform_indices = @transform_0, window_bounds = array<i64: 2, 32, 256>}, {transform_indices = @transform_1, window_bounds = array<i64: 2, 32, 1>}]} {
    %c0_i32 = arith.constant 0 : i32
    %0 = arith.cmpi eq, %arg1, %c0_i32 : i32
    %1 = arith.extui %0 : i1 to i32
    %c0_i32_0 = arith.constant 0 : i32
    %2 = arith.cmpi ne, %1, %c0_i32_0 : i32
    scf.if %2 {
      %cst_9 = arith.constant 0.000000e+00 : f32
      %9 = vector.broadcast %cst_9 : f32 to vector<2x32x1xf32>
      %c0_10 = arith.constant 0 : index
      %c0_11 = arith.constant 0 : index
      %c0_12 = arith.constant 0 : index
      %10 = vector.load %arg3[%c0_10, %c0_11, %c0_12] : memref<2x32x1xf32, #tpu.memory_space<vmem>>, vector<2x32x1xf32>
      tpu.vector_store %arg3[%c0_10, %c0_11, %c0_12], %9 {strides = array<i32>} : memref<2x32x1xf32, #tpu.memory_space<vmem>>, vector<2x32x1xf32>,
    } else {
    }
    %c0 = arith.constant 0 : index
    %c0_1 = arith.constant 0 : index
    %c0_2 = arith.constant 0 : index
    %3 = vector.load %arg2[%c0, %c0_1, %c0_2] : memref<2x32x256xf32, #tpu.memory_space<vmem>>, vector<2x32x256xf32>
    %c0_3 = arith.constant 0 : index
    %c0_4 = arith.constant 0 : index
    %c0_5 = arith.constant 0 : index
    %4 = vector.load %arg3[%c0_3, %c0_4, %c0_5] : memref<2x32x1xf32, #tpu.memory_space<vmem>>, vector<2x32x1xf32>
    %cst = arith.constant dense<0.000000e+00> : vector<2x32xf32>
    %5 = vector.multi_reduction <add>, %3, %cst [2] : vector<2x32x256xf32> to vector<2x32xf32>
    %6 = vector.shape_cast %5 : vector<2x32xf32> to vector<2x32x1xf32>
    %7 = arith.addf %4, %6 : vector<2x32x1xf32>
    %c0_6 = arith.constant 0 : index
    %c0_7 = arith.constant 0 : index
    %c0_8 = arith.constant 0 : index
    %8 = vector.load %arg3[%c0_6, %c0_7, %c0_8] : memref<2x32x1xf32, #tpu.memory_space<vmem>>, vector<2x32x1xf32>
    tpu.vector_store %arg3[%c0_6, %c0_7, %c0_8], %7 {strides = array<i32>} : memref<2x32x1xf32, #tpu.memory_space<vmem>>, vector<2x32x1xf32>,
    return
  }
  func.func @transform_0(%arg0: i32, %arg1: i32) -> (i32, i32, i32) {
    %c0_i32 = arith.constant 0 : i32
    %c0_i32_0 = arith.constant 0 : i32
    return %arg0, %c0_i32, %arg1 : i32, i32, i32
  }
  func.func @transform_1(%arg0: i32, %arg1: i32) -> (i32, i32, i32) {
    %c0_i32 = arith.constant 0 : i32
    %c0_i32_0 = arith.constant 0 : i32
    %c0_i32_1 = arith.constant 0 : i32
    return %arg0, %c0_i32, %c0_i32_0 : i32, i32, i32
  }
}

</mosaic_0001>

<bundles_post_ra>
// kernel: tpu_custom_call.1
= control target key start
LH: loop header
LB: loop body
LE: loop exit
PB: predicated region body
PF: predicated region fallthrough
CT: control target
= control target key end

     0   :  { %6 = vsyncpa [#allocation3], 0  ;;  %s133_s6 = smov [#allocation2]   ;;  %s247_s0 = inlined_call_operand.hbm [shape: f32[2,32,256], index: 0, kind: input, shape index: {}]   ;;  %s248_s1 = inlined_call_operand.vmem [shape: f32[2,32,1], index: 1, kind: output, shape index: {}]  }
   0x1   :  { %s12_s7 = sshll.u32 %s133_s6, 4  ;;  %s109_s10 = scalar_lea.hbm %s247_s0, 2048  ;;  %s13_s7 = int_to_ptr.vmem [resolvable:$true] %s12_s7 }
   0x2   :  { %p110_p0 = scmp.ne.s32.totalorder %s247_s0, %s109_s10  ;;  %p113_p1 = scmp.lt.u32.totalorder %s109_s10, %s247_s0 }
   0x4   :  { %p115_p2 = pnand %p113_p1, %p110_p0 }
   0x6   :  { %118 = shalt.err (!%p115_p2)
}
   0x7   :  { %s119_s15 = scalar_lea.vmem %s13_s7, 2048  ;;  %p124_p4 = scmp.lt.s32.totalorder %s13_s7, %s13_s7 }
   0x8   :  { %p120_p3 = scmp.ne.s32.totalorder %s13_s7, %s119_s15  ;;  %p125_p5 = scmp.lt.s32.totalorder %s119_s15, %s119_s15 }
   0xa   :  { %p126_p6 = por %p125_p5, %p124_p4 }
   0xc   :  { %p127_p7 = pnand %p126_p6, %p120_p3 }
   0xe   :  { %130 = shalt.err (!%p127_p7)
}
   0xf   :  { %s134_s16 = smov 256   ;;  %s135_s17 = smov 16  }
  0x10   :  { %18 = dma.hbm_to_vmem [thread:$0]  %s247_s0, 2048, %s13_s7, [#allocation3], %s134_s16, %s134_s16, %s135_s17  }
  0x11   :  { %131 = dma.done.wait [#allocation3], 2048  }
  0x12   :  { %132 = vsyncadd [#allocation3], 4294965248  ;;  %vm26_vm0 = vcmask 7168   ;;  %v136_v0 = vmov 0.0   ;;  %v39_v1 = vld [vmem:[#allocation2 + $0x20] sm:$0xff]  ;;  %v40_v2 = vld [vmem:[#allocation2 + $0x28] sm:$0xff] }
  0x13   :  { %29 = vst.msk [vmem:[%s248_s1 + $0x10] sm:$0xff] %vm26_vm0, %v136_v0  ;;  %27 = vst.msk [vmem:[%s248_s1] sm:$0xff] %vm26_vm0, %v136_v0  ;;  %v35_v3 = vld [vmem:[#allocation2] sm:$0xff]  ;;  %v65_v4 = vadd.f32 %v40_v2, %v39_v1  ;;  %v36_v5 = vld [vmem:[#allocation2 + $0x8] sm:$0xff] }
  0x14   :  { %28 = vst.msk [vmem:[%s248_s1 + $0x8] sm:$0xff] %vm26_vm0, %v136_v0  ;;  %30 = vst.msk [vmem:[%s248_s1 + $0x18] sm:$0xff] %vm26_vm0, %v136_v0  ;;  %v41_v6 = vld [vmem:[#allocation2 + $0x30] sm:$0xff]  ;;  %v42_v7 = vld [vmem:[#allocation2 + $0x38] sm:$0xff]  ;;  %v59_v8 = vadd.f32 %v36_v5, %v35_v3 }
  0x15   :  { %31 = vst.msk [vmem:[%s248_s1 + $0x20] sm:$0xff] %vm26_vm0, %v136_v0  ;;  %32 = vst.msk [vmem:[%s248_s1 + $0x28] sm:$0xff] %vm26_vm0, %v136_v0  ;;  %v37_v9 = vld [vmem:[#allocation2 + $0x10] sm:$0xff]  ;;  %v38_v10 = vld [vmem:[#allocation2 + $0x18] sm:$0xff]  ;;  %66 = vadd.xlane.f32.xlu1 %v65_v4  ;;  %v68_v11 = vadd.f32 %v42_v7, %v41_v6 }
  0x16   :  { %33 = vst.msk [vmem:[%s248_s1 + $0x30] sm:$0xff] %vm26_vm0, %v136_v0  ;;  %34 = vst.msk [vmem:[%s248_s1 + $0x38] sm:$0xff] %vm26_vm0, %v136_v0  ;;  %60 = vadd.xlane.f32.xlu0 %v59_v8  ;;  %v62_v12 = vadd.f32 %v38_v10, %v37_v9  ;;  %v45_v13 = vld [vmem:[#allocation2 + $0x50] sm:$0xff]  ;;  %v46_v14 = vld [vmem:[#allocation2 + $0x58] sm:$0xff] }
  0x17   :  { %v43_v15 = vld [vmem:[#allocation2 + $0x40] sm:$0xff]  ;;  %v44_v16 = vld [vmem:[#allocation2 + $0x48] sm:$0xff]  ;;  %v74_v17 = vadd.f32 %v46_v14, %v45_v13  ;;  %v49_v19 = vld [vmem:[#allocation2 + $0x70] sm:$0xff] }
  0x18   :  { %v71_v18 = vadd.f32 %v44_v16, %v43_v15  ;;  %v50_v20 = vld [vmem:[#allocation2 + $0x78] sm:$0xff]  ;;  %v47_v21 = vld [vmem:[#allocation2 + $0x60] sm:$0xff]  ;;  %v48_v22 = vld [vmem:[#allocation2 + $0x68] sm:$0xff] }
  0x19   :  { %69 = vadd.xlane.f32.xlu1 %v68_v11  ;;  %v80_v23 = vadd.f32 %v50_v20, %v49_v19  ;;  %v77_v24 = vadd.f32 %v48_v22, %v47_v21 }
  0x1a   :  { %63 = vadd.xlane.f32.xlu0 %v62_v12  ;;  %v53_v25 = vld [vmem:[%s248_s1 + $0x10] sm:$0xff]  ;;  %v51_v26 = vld [vmem:[%s248_s1] sm:$0xff] }
  0x1b   :  { %v54_v31 = vld [vmem:[%s248_s1 + $0x18] sm:$0xff]  ;;  %v52_v32 = vld [vmem:[%s248_s1 + $0x8] sm:$0xff] }
  0x1c   :  { %v56_v37 = vld [vmem:[%s248_s1 + $0x28] sm:$0xff]  ;;  %v55_v38 = vld [vmem:[%s248_s1 + $0x20] sm:$0xff] }
  0x1d   :  { %75 = vadd.xlane.f32.xlu1 %v74_v17  ;;  %v58_v43 = vld [vmem:[%s248_s1 + $0x38] sm:$0xff]  ;;  %v57_v44 = vld [vmem:[%s248_s1 + $0x30] sm:$0xff] }
  0x1e   :  { %72 = vadd.xlane.f32.xlu0 %v71_v18 }
  0x21   :  { %81 = vadd.xlane.f32.xlu1 %v80_v23 }
  0x22   :  { %78 = vadd.xlane.f32.xlu0 %v77_v24 }
  0xa2   :  { %v67_v27 = vpop.xlane.xlu1 %66 }
  0xa3   :  { %v85_v28 = vadd.f32 %v67_v27, %v53_v25  ;;  %v61_v29 = vpop.xlane.xlu0 %60 }
  0xa4   :  { %v83_v30 = vadd.f32 %v61_v29, %v51_v26 }
  0xa5   :  { %94 = vst.msk [vmem:[%s248_s1 + $0x10] sm:$0xff] %vm26_vm0, %v85_v28 }
  0xa6   :  { %92 = vst.msk [vmem:[%s248_s1] sm:$0xff] %vm26_vm0, %v83_v30  ;;  %v70_v33 = vpop.xlane.xlu1 %69 }
  0xa7   :  { %v86_v34 = vadd.f32 %v70_v33, %v54_v31  ;;  %v64_v35 = vpop.xlane.xlu0 %63 }
  0xa8   :  { %v84_v36 = vadd.f32 %v64_v35, %v52_v32 }
  0xa9   :  { %95 = vst.msk [vmem:[%s248_s1 + $0x18] sm:$0xff] %vm26_vm0, %v86_v34 }
  0xaa   :  { %93 = vst.msk [vmem:[%s248_s1 + $0x8] sm:$0xff] %vm26_vm0, %v84_v36  ;;  %v76_v39 = vpop.xlane.xlu1 %75 }
  0xab   :  { %v88_v40 = vadd.f32 %v76_v39, %v56_v37  ;;  %v73_v41 = vpop.xlane.xlu0 %72 }
  0xac   :  { %v87_v42 = vadd.f32 %v73_v41, %v55_v38 }
  0xad   :  { %97 = vst.msk [vmem:[%s248_s1 + $0x28] sm:$0xff] %vm26_vm0, %v88_v40 }
  0xae   :  { %96 = vst.msk [vmem:[%s248_s1 + $0x20] sm:$0xff] %vm26_vm0, %v87_v42  ;;  %v82_v45 = vpop.xlane.xlu1 %81 }
  0xaf   :  { %v90_v46 = vadd.f32 %v82_v45, %v58_v43  ;;  %v79_v47 = vpop.xlane.xlu0 %78 }
  0xb0   :  { %v89_v48 = vadd.f32 %v79_v47, %v57_v44 }
  0xb1   :  { %99 = vst.msk [vmem:[%s248_s1 + $0x38] sm:$0xff] %vm26_vm0, %v90_v46 }
  0xb2   :  { %98 = vst.msk [vmem:[%s248_s1 + $0x30] sm:$0xff] %vm26_vm0, %v89_v48 }
  0xb3   :  { %104 = vsyncpa [#allocation3], 1 }

</bundles_post_ra>
